<compile_context>
chip_gen: v7x
topology: tpu7x:2x2x1
jax: 0.10.0
libtpu: 0.0.40
codegen_flags: <defaults>
</compile_context>

<pallas_src>
import jax
import jax.numpy as jnp
from jax.experimental import pallas as pl
from jax.experimental.pallas import tpu as pltpu


FREQ_MAP = {'h': 4, 't': 5, 's': 6, 'm': 1, 'a': 1, 'w': 2, 'd': 3, 'b': 3}

_LANE = 128
_SUBLANE = 8
_VMEM_BUDGET = 28 * 1024 * 1024   # tile-selection budget (fits v7x's 32 MiB scoped default)
_MIN_VMEM_LIMIT = 16 * 1024 * 1024


def _round_up(x: int, m: int) -> int:
    return ((x + m - 1) // m) * m


def _tensorcores_per_chip() -> int:
    """2 only on v7x (megacore grid sharding pays off); v5e/v6e are single-TC."""
    try:
        kind = (getattr(jax.devices()[0], "device_kind", "") or "").lower()
        if "v7" in kind:
            return 2
    except Exception:
        pass
    return 1


def time_feature_embed_kernel(x_ref, w_ref, o_ref):
    # x_ref: (tm, d_inp_pad) f32, w_ref: (d_inp_pad, d_model_out) f32 (resident,
    # constant index_map -> DMA'd once), o_ref: (tm, d_model_out) out_dtype.
    acc = jnp.dot(x_ref[...], w_ref[...],
                  preferred_element_type=jnp.float32,
                  precision=jax.lax.Precision.HIGHEST)
    o_ref[...] = acc.astype(o_ref.dtype)


def _pick_tile_m(n, d_inp_pad, d_model_out, tile_m, out_itemsize, num_cores, row_q):
    # Honest VMEM accounting: the last dim of every VMEM buffer is lane-padded to
    # >=128 (a (tm, 8) f32 tile really occupies tm*128*4 bytes per buffer).
    x_row = 4 * max(d_inp_pad, _LANE)
    o_row = out_itemsize * _round_up(d_model_out, _LANE)
    per_row = 2 * (x_row + o_row)                                   # double-buffered x + out
    w_bytes = 2 * 4 * _round_up(d_inp_pad, _SUBLANE) * _round_up(d_model_out, _LANE)

    max_rows = max(row_q, (_VMEM_BUDGET - w_bytes) // per_row)
    max_rows = max(row_q, (max_rows // row_q) * row_q)

    tm = min(tile_m, _round_up(n, row_q), max_rows)
    tm = max(row_q, (tm // row_q) * row_q)

    if num_cores >= 2 and n > row_q:
        # v7x: split across both TensorCores with an EVEN number of grid steps so
        # neither core idles on a tail step.
        steps = max(2, pl.cdiv(n, tm))
        if steps % 2:
            steps += 1
        tm = max(row_q, _round_up(pl.cdiv(n, steps), row_q))
    return tm


def _vmem_limit_bytes(tm, d_inp_pad, d_model_out, out_itemsize):
    x_row = 4 * max(d_inp_pad, _LANE)
    o_row = out_itemsize * _round_up(d_model_out, _LANE)
    w_bytes = 2 * 4 * _round_up(d_inp_pad, _SUBLANE) * _round_up(d_model_out, _LANE)
    footprint = tm * 2 * (x_row + o_row) + w_bytes
    # 25% + 4 MiB headroom for compiler-internal scratch; floor keeps tiny problems safe.
    return int(min(max(footprint * 5 // 4 + (4 << 20), _MIN_VMEM_LIMIT), 48 << 20))


def time_feature_embedding(x: jnp.ndarray, weight: jnp.ndarray, *,
                           tile_m: int = 4096, out_dtype=None) -> jnp.ndarray:
    """x: (B, L, d_inp) float time features, weight: (d_model, d_inp) (PyTorch layout).
    Returns (B, L, d_model) = x @ weight.T (bias-free linear).
    out_dtype defaults to float32 (PyTorch parity); pass jnp.bfloat16 to halve the
    output HBM traffic of this write-bound kernel if the consumer accepts it."""
    B, L, d_inp = x.shape
    d_model = weight.shape[0]
    assert weight.shape[1] == d_inp

    out_dtype = jnp.dtype(out_dtype) if out_dtype is not None else jnp.dtype(jnp.float32)
    out_itemsize = out_dtype.itemsize
    row_q = {4: 8, 2: 16, 1: 32}.get(out_itemsize, 8)   # sublane quantum per dtype width

    # Contraction dim padded to a sublane multiple (zero padding is exact for a
    # bias-free linear; input is tiny so this copy is negligible).
    d_inp_pad = _round_up(d_inp, _SUBLANE)
    # d_model: pad to 128 lanes only when d_model < 128 (small output -> tiny slice).
    # Otherwise store straight into an (n, d_model) output: no wrapper-side slice copy
    # of the dominant array, at worst one masked vst on the final partial vreg per tile.
    d_model_out = _LANE if d_model < _LANE else d_model

    w_t = jnp.zeros((d_inp_pad, d_model_out), jnp.float32)
    w_t = w_t.at[:d_inp, :d_model].set(weight.T.astype(jnp.float32))

    n = B * L
    x2 = x.astype(jnp.float32).reshape(n, d_inp)
    if d_inp_pad != d_inp:
        x2 = jnp.pad(x2, ((0, 0), (0, d_inp_pad - d_inp)))

    num_cores = _tensorcores_per_chip()
    tm = _pick_tile_m(n, d_inp_pad, d_model_out, tile_m, out_itemsize, num_cores, row_q)
    # No explicit row padding: Pallas handles the ragged last block (OOB writes dropped).
    grid = (pl.cdiv(n, tm),)

    cost = pl.CostEstimate(
        flops=2 * n * d_inp_pad * d_model_out,
        transcendentals=0,
        bytes_accessed=(4 * n * d_inp_pad
                        + 4 * d_inp_pad * d_model_out
                        + out_itemsize * n * d_model_out),
    )

    out = pl.pallas_call(
        time_feature_embed_kernel,
        out_shape=jax.ShapeDtypeStruct((n, d_model_out), out_dtype),
        grid_spec=pltpu.PrefetchScalarGridSpec(
            num_scalar_prefetch=0,
            grid=grid,
            in_specs=[
                pl.BlockSpec((tm, d_inp_pad), lambda i: (i, 0)),
                # Resident weight: constant index_map -> fetched once across the grid.
                # TODO(synk): pipeline_mode=pl.Buffered(1) would drop the 2nd weight
                # buffer (a few KiB); left at the default double-buffer for portability.
                pl.BlockSpec((d_inp_pad, d_model_out), lambda i: (0, 0)),
            ],
            out_specs=pl.BlockSpec((tm, d_model_out), lambda i: (i, 0)),
        ),
        compiler_params=pltpu.CompilerParams(
            dimension_semantics=("parallel",),
            vmem_limit_bytes=_vmem_limit_bytes(tm, d_inp_pad, d_model_out, out_itemsize),
        ),
        cost_estimate=cost,
    )(x2, w_t)

    if d_model_out != d_model:
        out = out[:, :d_model]
    return out.reshape(B, L, d_model)


def time_feature_embedding_ref(x: jnp.ndarray, weight: jnp.ndarray) -> jnp.ndarray:
    """Pure-JAX reference matching the PyTorch forward: x @ W.T (no bias)."""
    return jnp.einsum('bld,md->blm',
                      x.astype(jnp.float32), weight.astype(jnp.float32),
                      precision=jax.lax.Precision.HIGHEST)


if __name__ == "__main__":
    B, L, d_model, freq = 2, 8, 32, 'h'
    d_inp = FREQ_MAP[freq]

    key = jax.random.PRNGKey(0)
    kx, kw = jax.random.split(key)
    # timeF-style features are continuous values roughly in [-0.5, 0.5]
    x = jax.random.uniform(kx, (B, L, d_inp), jnp.float32, minval=-0.5, maxval=0.5)
    bound = 1.0 / (d_inp ** 0.5)   # PyTorch nn.Linear default init range
    weight = jax.random.uniform(kw, (d_model, d_inp), jnp.float32,
                                minval=-bound, maxval=bound)

    out = jax.block_until_ready(time_feature_embedding(x, weight))
    ref = time_feature_embedding_ref(x, weight)

    assert out.shape == (B, L, d_model)
    assert out.dtype == jnp.float32
    assert jnp.allclose(out, ref, atol=1e-5, rtol=1e-5), "mismatch vs reference"
    print("KERNEL_OK")
</pallas_src>

<mosaic_0001>
module attributes {stable_mosaic.version = 11 : i64} {
  func.func @time_feature_embed_kernel(%arg0: i32, %arg1: memref<16x8xf32, #tpu.memory_space<vmem>>, %arg2: memref<8x128xf32, #tpu.memory_space<vmem>>, %arg3: memref<16x128xf32, #tpu.memory_space<vmem>>) attributes {dimension_semantics = [#tpu.dimension_semantics<parallel>], iteration_bounds = array<i64: 1>, scalar_prefetch = 0 : i64, scratch_operands = 0 : i64, tpu.core_type = #tpu.core_type<tc>, window_params = [{transform_indices = @transform_0, window_bounds = array<i64: 16, 8>}, {pipeline_mode = #tpu.pipeline_mode<synchronous>, transform_indices = @transform_1, window_bounds = array<i64: 8, 128>}, {transform_indices = @transform_2, window_bounds = array<i64: 16, 128>}]} {
    %c0 = arith.constant 0 : index
    %c0_0 = arith.constant 0 : index
    %0 = vector.load %arg1[%c0, %c0_0] : memref<16x8xf32, #tpu.memory_space<vmem>>, vector<16x8xf32>
    %c0_1 = arith.constant 0 : index
    %c0_2 = arith.constant 0 : index
    %1 = vector.load %arg2[%c0_1, %c0_2] : memref<8x128xf32, #tpu.memory_space<vmem>>, vector<8x128xf32>
    %cst = arith.constant dense<0.000000e+00> : vector<16x128xf32>
    %2 = tpu.matmul %0, %1, %cst {dimension_numbers = #tpu.dot_dimension_numbers<[1], [0], [0], [1], [0, 0, 1, 1], [], []>, precision = #tpu.contract_precision<fp32>} : vector<16x8xf32>, vector<8x128xf32>, vector<16x128xf32> -> vector<16x128xf32>
    %c0_3 = arith.constant 0 : index
    %c0_4 = arith.constant 0 : index
    %3 = vector.load %arg3[%c0_3, %c0_4] : memref<16x128xf32, #tpu.memory_space<vmem>>, vector<16x128xf32>
    tpu.vector_store %arg3[%c0_3, %c0_4], %2 {strides = array<i32>} : memref<16x128xf32, #tpu.memory_space<vmem>>, vector<16x128xf32>,
    return
  }
  func.func @transform_0(%arg0: i32) -> (i32, i32) {
    %c0_i32 = arith.constant 0 : i32
    %c0_i32_0 = arith.constant 0 : i32
    return %arg0, %c0_i32 : i32, i32
  }
  func.func @transform_1(%arg0: i32) -> (i32, i32) {
    %c0_i32 = arith.constant 0 : i32
    %c0_i32_0 = arith.constant 0 : i32
    %c0_i32_1 = arith.constant 0 : i32
    return %c0_i32, %c0_i32_0 : i32, i32
  }
  func.func @transform_2(%arg0: i32) -> (i32, i32) {
    %c0_i32 = arith.constant 0 : i32
    %c0_i32_0 = arith.constant 0 : i32
    return %arg0, %c0_i32 : i32, i32
  }
}

</mosaic_0001>

<bundles_post_ra>
// kernel: tpu_custom_call.1
= control target key start
LH: loop header
LB: loop body
LE: loop exit
PB: predicated region body
PF: predicated region fallthrough
CT: control target
= control target key end

     0   :  { %vm15_vm0 = vcmask 64512   ;;  %s653_s0 = inlined_call_operand.vmem [shape: f32[16,8], index: 0, kind: input, shape index: {}]   ;;  %s654_s1 = inlined_call_operand.vmem [shape: f32[8,128], index: 1, kind: input, shape index: {}]   ;;  %s655_s2 = inlined_call_operand.hbm [shape: f32[16,128], index: 2, kind: output, shape index: {}]  }
   0x1   :  { %v14_v0 = vld [vmem:[%s654_s1] sm:$0xff]  ;;  %v13_v2 = vld [vmem:[%s653_s0 + $0x8] sm:$0xff] }
   0x2   :  { %v12_v1 = vld [vmem:[%s653_s0] sm:$0xff]  ;;  %v23_v3 = vand.u32 4294901760, %v14_v0  ;;  %v20_v5 = vsel %vm15_vm0, %v13_v2, 0 }
   0x3   :  { %v17_v4 = vsel %vm15_vm0, %v12_v1, 0 }
   0x4   :  { %7 = vsyncpa [#allocation3], 0  ;;  %v88_v6 = vand.u32 4294901760, %v17_v4  ;;  %v98_v7 = vand.u32 4294901760, %v20_v5  ;;  %562 = vmatprep.subr.mxu0 %v23_v3  ;;  %547 = vmatprep.subr.mxu1 %v23_v3  ;;  %v110_v8 = vsub.f32 %v14_v0, %v23_v3  ;;  %s614_s0 = smov [#allocation2]  }
   0x5   :  { %563 = vmatpush3.msra.mxu0 %v23_v3  ;;  %548 = vmatpush3.msra.mxu1 %v23_v3  ;;  %s518_s1 = sshll.u32 %s614_s0, 4  ;;  %s519_s1 = int_to_ptr.vmem [resolvable:$true] %s518_s1 }
   0x6   :  { %v89_v9 = vsub.f32 %v17_v4, %v88_v6  ;;  %v99_v10 = vsub.f32 %v20_v5, %v98_v7  ;;  %v111_v11 = vand.u32 4294901760, %v110_v8  ;;  %s590_s15 = scalar_lea.vmem %s519_s1, 256  ;;  %p595_p1 = scmp.lt.s32.totalorder %s519_s1, %s519_s1 }
   0x7   :  { %p591_p0 = scmp.ne.s32.totalorder %s519_s1, %s590_s15  ;;  %p596_p2 = scmp.lt.s32.totalorder %s590_s15, %s590_s15 }
   0x8   :  { %v90_v12 = vand.u32 4294901760, %v89_v9  ;;  %v100_v13 = vand.u32 4294901760, %v99_v10  ;;  %v112_v14 = vsub.f32 %v110_v8, %v111_v11  ;;  %567 = vmatprep.subr.mxu0 %v111_v11 }
   0x9   :  { %p597_p3 = por %p596_p2, %p595_p1 }
   0xa   :  { %564 = vmatprep.mubr.f32.mxu0 %v90_v12  ;;  %v91_v15 = vsub.f32 %v89_v9, %v90_v12  ;;  %v101_v16 = vsub.f32 %v99_v10, %v100_v13  ;;  %v113_v17 = vand.u32 4294901760, %v112_v14 }
   0xb   :  { %565 = vmatmul.mubr.f32.vlgmr.msra.gmra.mrb[0].mxu0 %v100_v13  ;;  %p598_p4 = pnand %p597_p3, %p591_p0 }
   0xc   :  { %v92_v18 = vand.u32 4294901760, %v91_v15  ;;  %v102_v19 = vand.u32 4294901760, %v101_v16  ;;  %568 = vmatpush3.msra.mxu0 %v111_v11  ;;  %569 = vmatprep.mubr.f32.mxu0 %v88_v6 }
   0xd   :  { %552 = vmatprep.subr.mxu1 %v113_v17  ;;  %572 = vmatprep.subr.mxu0 %v23_v3 }
   0xe   :  { %549 = vmatprep.mubr.f32.mxu1 %v92_v18 }
   0xf   :  { %550 = vmatmul.mubr.f32.vlgmr.msra.gmra.mrb[0].mxu1 %v102_v19 }
  0x10   :  { %553 = vmatpush3.msra.mxu1 %v113_v17  ;;  %554 = vmatprep.mubr.f32.mxu1 %v88_v6 }
  0x11   :  { %557 = vmatprep.subr.mxu1 %v110_v8 }
  0x13   :  { %570 = vmatmul.mubr.f32.vlgmr.msra.gmra.mrb[0].mxu0 %v98_v7 }
  0x14   :  { %573 = vmatpush3.msra.mxu0 %v23_v3  ;;  %574 = vmatprep.mubr.f32.mxu0 %v88_v6 }
  0x17   :  { %555 = vmatmul.mubr.f32.vlgmr.msra.gmra.mrb[0].mxu1 %v98_v7 }
  0x18   :  { %558 = vmatpush3.msra.mxu1 %v110_v8  ;;  %559 = vmatprep.mubr.f32.mxu1 %v89_v9 }
  0x1b   :  { %575 = vmatmul.mubr.f32.vlgmr.msra.gmra.mrb[0].mxu0 %v98_v7 }
  0x1f   :  { %560 = vmatmul.mubr.f32.vlgmr.msra.gmra.mrb[0].mxu1 %v99_v10 }
  0xee   :  { %v576_v20 = vpop.f32.mrb[0].mxu0 }
  0xef   :  { %v501_v21 = vpop.f32.mrb[1].mxu0 }
  0xf2   :  { %v561_v22 = vpop.f32.mrb[0].mxu1 }
  0xf3   :  { %v577_v23 = vadd.f32 %v576_v20, %v561_v22  ;;  %v260_v24 = vpop.f32.mrb[1].mxu1 }
  0xf4   :  { %v578_v25 = vadd.f32 %v501_v21, %v260_v24 }
  0xf5   :  { %512 = vst [vmem:[#allocation2 + $0x8] sm:$0xff] %v577_v23 }
  0xf6   :  { %511 = vst [vmem:[#allocation2] sm:$0xff] %v578_v25 }
  0xf7   :  { %601 = shalt.err (!%p598_p4)
}
  0xf8   :  { %s602_s18 = scalar_lea.hbm %s655_s2, 256 }
  0xf9   :  { %p603_p5 = scmp.ne.s32.totalorder %s655_s2, %s602_s18  ;;  %p606_p6 = scmp.lt.u32.totalorder %s602_s18, %s655_s2 }
  0xfb   :  { %p608_p7 = pnand %p606_p6, %p603_p5 }
  0xfd   :  { %611 = shalt.err (!%p608_p7)
}
  0xfe   :  { %s615_s23 = smov 128   ;;  %s616_s24 = smov 8  }
  0xff   :  { %524 = dma.vmem_to_hbm [thread:$0]  %s519_s1, 256, %s655_s2, [#allocation3], %s615_s23, %s615_s23, %s616_s24  }
 0x100   :  { %612 = dma.done.wait [#allocation3], 256  }
 0x101   :  { %613 = vsyncadd [#allocation3], 4294967040 }
 0x102   :  { %528 = vsyncpa [#allocation3], 1 }

</bundles_post_ra>
